<compile_context>
chip_gen: v7x
topology: tpu7x:2x2x1
jax: 0.10.0
libtpu: 0.0.40
codegen_flags: <defaults>
</compile_context>

<pallas_src>
import jax
import jax.numpy as jnp
from jax.experimental import pallas as pl
from jax.experimental.pallas import tpu as pltpu


def simplenet_kernel(x_ref,
                     w1_ref, b1_ref,
                     w2_ref, b2_ref,
                     w3_ref, b3_ref,
                     w4_ref, b4_ref,
                     o_ref):
    # x tile: (2, TB) — batch on lanes.  Compute fc1 in f32 on the VPU.
    x = x_ref[...].astype(jnp.float32)
    w1 = w1_ref[...].astype(jnp.float32)          # (64, 2)

    # fc1 + relu as two broadcast FMAs: (64,1)*(1,TB) broadcasts on both axes.
    # A K=2 matmul would use <1% of the 256x256 MXU and still pay a weight
    # swap; the VPU slots are otherwise idle here.
    h = w1[:, 0:1] * x[0:1, :] + w1[:, 1:2] * x[1:2, :] + b1_ref[...]
    h = jnp.maximum(h, 0.0)

    # fc2 + relu   (32, 64) @ (64, TB) -> (32, TB)    [MXU, f32 accumulate]
    h = jnp.dot(w2_ref[...], h.astype(w2_ref.dtype),
                preferred_element_type=jnp.float32) + b2_ref[...]
    h = jnp.maximum(h, 0.0)

    # fc3 + relu   (64, 32) @ (32, TB) -> (64, TB)
    h = jnp.dot(w3_ref[...], h.astype(w3_ref.dtype),
                preferred_element_type=jnp.float32) + b3_ref[...]
    h = jnp.maximum(h, 0.0)

    # fc4 (no activation)   (2, 64) @ (64, TB) -> (2, TB)
    h = jnp.dot(w4_ref[...], h.astype(w4_ref.dtype),
                preferred_element_type=jnp.float32) + b4_ref[...]

    o_ref[...] = h.astype(o_ref.dtype)


def simplenet_forward(x, params, *, max_batch_tile=8192, use_bf16=False,
                      x_transposed=False, return_transposed=False):
    """SimpleNet forward.

    x: (B, 2) float32 (or (2, B) if x_transposed=True).
    params: PyTorch-native weights w{i} (out, in), biases b{i} (out, 1).
    Returns (B, 2) float32 (or (2, B) if return_transposed=True).
    use_bf16: cast x / weights to bf16 for the MXU inputs (f32 accumulate,
              f32 bias/ReLU); slight numerics change, halves x HBM traffic.
    """
    if x_transposed:
        in_dim, B = x.shape
        x_t = x                                   # already lane-dense
    else:
        B, in_dim = x.shape
        x_t = x.T                                 # single XLA transpose
    out_dim = params["w4"].shape[0]

    # ---- batch-tile selection --------------------------------------------
    # Lane-aligned (multiple of 128) even for custom max_batch_tile; capped at
    # 32768 to stay inside a v7x per-TC VMEM budget.
    max_tile = max(128, (int(max_batch_tile) // 128) * 128)
    max_tile = min(max_tile, 32768)
    # Aim for >= 2 grid steps whenever the batch spans more than one tile so
    # the "parallel" axis can shard across v7x's 2 TensorCores, while still
    # letting huge batches use the full max_tile.
    half = pl.cdiv(B, 2)
    tb = min(max_tile, max(128, pl.cdiv(half, 128) * 128))
    grid_n = pl.cdiv(B, tb)
    b_pad = grid_n * tb

    # Fused pad of the transposed input (no zeros+scatter round trip); padded
    # columns are sliced off the output below.
    if b_pad != B:
        x_t = jnp.pad(x_t, ((0, 0), (0, b_pad - B)))

    in_dtype = jnp.bfloat16 if use_bf16 else jnp.float32
    x_t = x_t.astype(in_dtype)

    def cast_w(w):
        return w.astype(in_dtype)

    # Biases always stay f32 (added after the f32-accumulated matmul).
    weight_args = (cast_w(params["w1"]), params["b1"].astype(jnp.float32),
                   cast_w(params["w2"]), params["b2"].astype(jnp.float32),
                   cast_w(params["w3"]), params["b3"].astype(jnp.float32),
                   cast_w(params["w4"]), params["b4"].astype(jnp.float32))

    # ---- VMEM budget -------------------------------------------------------
    # Per step: double-buffered x/out tiles + fc1..fc3 intermediates (f32) +
    # resident weights.  With the 8192 default this is ~5.5 MiB, well under
    # every generation's scoped default; only raise the limit when a caller
    # pushes the tile past v5e's 16 MiB scoped default.
    itemsize = 2 if use_bf16 else 4
    step_bytes = (2 * in_dim * tb * itemsize            # x, double-buffered
                  + 2 * out_dim * tb * 4                # out, double-buffered
                  + (64 + 32 + 64) * tb * 4             # layer intermediates
                  + (64 << 10))                         # resident weights/biases
    vmem_limit = None
    if step_bytes > (12 << 20):
        vmem_limit = int(min(max(2 * step_bytes, 32 << 20), 48 << 20))

    # ---- specs -------------------------------------------------------------
    # x / out: one (features, TB) lane-dense tile per grid step (pipelined DMA).
    x_spec = pl.BlockSpec((in_dim, tb), lambda i: (0, i))
    out_spec = pl.BlockSpec((out_dim, tb), lambda i: (0, i))
    # Weights/biases: full-extent block, constant block index -> VMEM-resident
    # across the grid (no per-step re-DMA).  NOTE: pipeline_mode=pl.Buffered(1)
    # would trim ~18 KiB of never-used second buffers; skipped as it is
    # negligible next to the tile footprint.
    resident = lambda a: pl.BlockSpec(a.shape, lambda i: (0,) * a.ndim)

    out_t = pl.pallas_call(
        simplenet_kernel,
        out_shape=jax.ShapeDtypeStruct((out_dim, b_pad), jnp.float32),
        grid=(grid_n,),
        in_specs=[x_spec] + [resident(a) for a in weight_args],
        out_specs=out_spec,
        compiler_params=pltpu.CompilerParams(
            dimension_semantics=("parallel",),      # megacore sharding on v7x
            vmem_limit_bytes=vmem_limit),
    )(x_t, *weight_args)

    if b_pad != B:
        out_t = out_t[:, :B]
    return out_t if return_transposed else out_t.T


def init_params(key):
    """Deterministic synthetic init (PyTorch-style uniform bounds).
    Weights stored PyTorch-native (out, in); biases as (out, 1)."""
    sizes = [(2, 64), (64, 32), (32, 64), (64, 2)]  # (in, out) per layer
    params = {}
    for i, (fan_in, fan_out) in enumerate(sizes, start=1):
        key, kw, kb = jax.random.split(key, 3)
        bound = 1.0 / (fan_in ** 0.5)
        params[f"w{i}"] = jax.random.uniform(
            kw, (fan_out, fan_in), jnp.float32, minval=-bound, maxval=bound)
        params[f"b{i}"] = jax.random.uniform(
            kb, (fan_out, 1), jnp.float32, minval=-bound, maxval=bound)
    return params


def reference_forward(x, params):
    h = jnp.maximum(x @ params["w1"].T + params["b1"].T, 0.0)
    h = jnp.maximum(h @ params["w2"].T + params["b2"].T, 0.0)
    h = jnp.maximum(h @ params["w3"].T + params["b3"].T, 0.0)
    return h @ params["w4"].T + params["b4"].T


if __name__ == "__main__":
    key = jax.random.PRNGKey(0)
    key, kx1, kx2 = jax.random.split(key, 3)
    params = init_params(key)

    # Small test (matches the module's tiny input scale): single-tile path.
    B1 = 8
    x1 = jax.random.normal(kx1, (B1, 2), dtype=jnp.float32)
    out1 = jax.block_until_ready(simplenet_forward(x1, params))
    ref1 = reference_forward(x1, params)
    assert out1.shape == (B1, 2)
    assert jnp.allclose(out1, ref1, atol=1e-5, rtol=1e-5)

    # Second test: multi-step grid + padded partial last tile (v7x 2-TC path).
    B2 = 300
    x2 = jax.random.normal(kx2, (B2, 2), dtype=jnp.float32)
    out2 = jax.block_until_ready(simplenet_forward(x2, params))
    ref2 = reference_forward(x2, params)
    assert out2.shape == (B2, 2)
    assert jnp.allclose(out2, ref2, atol=1e-5, rtol=1e-5)

    print("KERNEL_OK")
</pallas_src>

<mosaic_0001>
module attributes {stable_mosaic.version = 11 : i64} {
  func.func @simplenet_kernel(%arg0: i32, %arg1: memref<2x128xf32, #tpu.memory_space<vmem>>, %arg2: memref<64x2xf32, #tpu.memory_space<vmem>>, %arg3: memref<64x1xf32, #tpu.memory_space<vmem>>, %arg4: memref<32x64xf32, #tpu.memory_space<vmem>>, %arg5: memref<32x1xf32, #tpu.memory_space<vmem>>, %arg6: memref<64x32xf32, #tpu.memory_space<vmem>>, %arg7: memref<64x1xf32, #tpu.memory_space<vmem>>, %arg8: memref<2x64xf32, #tpu.memory_space<vmem>>, %arg9: memref<2x1xf32, #tpu.memory_space<vmem>>, %arg10: memref<2x128xf32, #tpu.memory_space<vmem>>) attributes {dimension_semantics = [#tpu.dimension_semantics<parallel>], iteration_bounds = array<i64: 1>, scalar_prefetch = 0 : i64, scratch_operands = 0 : i64, tpu.core_type = #tpu.core_type<tc>, window_params = [{transform_indices = @transform_0, window_bounds = array<i64: 2, 128>}, {pipeline_mode = #tpu.pipeline_mode<synchronous>, transform_indices = @transform_1, window_bounds = array<i64: 64, 2>}, {pipeline_mode = #tpu.pipeline_mode<synchronous>, transform_indices = @transform_2, window_bounds = array<i64: 64, 1>}, {pipeline_mode = #tpu.pipeline_mode<synchronous>, transform_indices = @transform_3, window_bounds = array<i64: 32, 64>}, {pipeline_mode = #tpu.pipeline_mode<synchronous>, transform_indices = @transform_4, window_bounds = array<i64: 32, 1>}, {pipeline_mode = #tpu.pipeline_mode<synchronous>, transform_indices = @transform_5, window_bounds = array<i64: 64, 32>}, {pipeline_mode = #tpu.pipeline_mode<synchronous>, transform_indices = @transform_6, window_bounds = array<i64: 64, 1>}, {pipeline_mode = #tpu.pipeline_mode<synchronous>, transform_indices = @transform_7, window_bounds = array<i64: 2, 64>}, {pipeline_mode = #tpu.pipeline_mode<synchronous>, transform_indices = @transform_8, window_bounds = array<i64: 2, 1>}, {transform_indices = @transform_9, window_bounds = array<i64: 2, 128>}]} {
    %c0 = arith.constant 0 : index
    %c0_0 = arith.constant 0 : index
    %0 = vector.load %arg1[%c0, %c0_0] : memref<2x128xf32, #tpu.memory_space<vmem>>, vector<2x128xf32>
    %c0_1 = arith.constant 0 : index
    %c0_2 = arith.constant 0 : index
    %1 = vector.load %arg2[%c0_1, %c0_2] : memref<64x2xf32, #tpu.memory_space<vmem>>, vector<64x2xf32>
    %2 = vector.extract_strided_slice %1 {offsets = [0, 0], sizes = [64, 1], strides = [1, 1]} : vector<64x2xf32> to vector<64x1xf32>
    %3 = vector.extract_strided_slice %0 {offsets = [0, 0], sizes = [1, 128], strides = [1, 1]} : vector<2x128xf32> to vector<1x128xf32>
    %4 = vector.broadcast %2 : vector<64x1xf32> to vector<64x128xf32>
    %5 = vector.broadcast %3 : vector<1x128xf32> to vector<64x128xf32>
    %6 = arith.mulf %4, %5 : vector<64x128xf32>
    %7 = vector.extract_strided_slice %1 {offsets = [0, 1], sizes = [64, 1], strides = [1, 1]} : vector<64x2xf32> to vector<64x1xf32>
    %8 = vector.extract_strided_slice %0 {offsets = [1, 0], sizes = [1, 128], strides = [1, 1]} : vector<2x128xf32> to vector<1x128xf32>
    %9 = vector.broadcast %7 : vector<64x1xf32> to vector<64x128xf32>
    %10 = vector.broadcast %8 : vector<1x128xf32> to vector<64x128xf32>
    %11 = arith.mulf %9, %10 : vector<64x128xf32>
    %12 = arith.addf %6, %11 : vector<64x128xf32>
    %c0_3 = arith.constant 0 : index
    %c0_4 = arith.constant 0 : index
    %13 = vector.load %arg3[%c0_3, %c0_4] : memref<64x1xf32, #tpu.memory_space<vmem>>, vector<64x1xf32>
    %14 = vector.broadcast %13 : vector<64x1xf32> to vector<64x128xf32>
    %15 = arith.addf %12, %14 : vector<64x128xf32>
    %cst = arith.constant 0.000000e+00 : f32
    %16 = vector.broadcast %cst : f32 to vector<64x128xf32>
    %17 = arith.maximumf %15, %16 : vector<64x128xf32>
    %c0_5 = arith.constant 0 : index
    %c0_6 = arith.constant 0 : index
    %18 = vector.load %arg4[%c0_5, %c0_6] : memref<32x64xf32, #tpu.memory_space<vmem>>, vector<32x64xf32>
    %cst_7 = arith.constant dense<0.000000e+00> : vector<32x128xf32>
    %19 = tpu.matmul %18, %17, %cst_7 {dimension_numbers = #tpu.dot_dimension_numbers<[1], [0], [0], [1], [0, 0, 1, 1], [], []>} : vector<32x64xf32>, vector<64x128xf32>, vector<32x128xf32> -> vector<32x128xf32>
    %c0_8 = arith.constant 0 : index
    %c0_9 = arith.constant 0 : index
    %20 = vector.load %arg5[%c0_8, %c0_9] : memref<32x1xf32, #tpu.memory_space<vmem>>, vector<32x1xf32>
    %21 = vector.broadcast %20 : vector<32x1xf32> to vector<32x128xf32>
    %22 = arith.addf %19, %21 : vector<32x128xf32>
    %cst_10 = arith.constant 0.000000e+00 : f32
    %23 = vector.broadcast %cst_10 : f32 to vector<32x128xf32>
    %24 = arith.maximumf %22, %23 : vector<32x128xf32>
    %c0_11 = arith.constant 0 : index
    %c0_12 = arith.constant 0 : index
    %25 = vector.load %arg6[%c0_11, %c0_12] : memref<64x32xf32, #tpu.memory_space<vmem>>, vector<64x32xf32>
    %cst_13 = arith.constant dense<0.000000e+00> : vector<64x128xf32>
    %26 = tpu.matmul %25, %24, %cst_13 {dimension_numbers = #tpu.dot_dimension_numbers<[1], [0], [0], [1], [0, 0, 1, 1], [], []>} : vector<64x32xf32>, vector<32x128xf32>, vector<64x128xf32> -> vector<64x128xf32>
    %c0_14 = arith.constant 0 : index
    %c0_15 = arith.constant 0 : index
    %27 = vector.load %arg7[%c0_14, %c0_15] : memref<64x1xf32, #tpu.memory_space<vmem>>, vector<64x1xf32>
    %28 = vector.broadcast %27 : vector<64x1xf32> to vector<64x128xf32>
    %29 = arith.addf %26, %28 : vector<64x128xf32>
    %cst_16 = arith.constant 0.000000e+00 : f32
    %30 = vector.broadcast %cst_16 : f32 to vector<64x128xf32>
    %31 = arith.maximumf %29, %30 : vector<64x128xf32>
    %c0_17 = arith.constant 0 : index
    %c0_18 = arith.constant 0 : index
    %32 = vector.load %arg8[%c0_17, %c0_18] : memref<2x64xf32, #tpu.memory_space<vmem>>, vector<2x64xf32>
    %cst_19 = arith.constant dense<0.000000e+00> : vector<2x128xf32>
    %33 = tpu.matmul %32, %31, %cst_19 {dimension_numbers = #tpu.dot_dimension_numbers<[1], [0], [0], [1], [0, 0, 1, 1], [], []>} : vector<2x64xf32>, vector<64x128xf32>, vector<2x128xf32> -> vector<2x128xf32>
    %c0_20 = arith.constant 0 : index
    %c0_21 = arith.constant 0 : index
    %34 = vector.load %arg9[%c0_20, %c0_21] : memref<2x1xf32, #tpu.memory_space<vmem>>, vector<2x1xf32>
    %35 = vector.broadcast %34 : vector<2x1xf32> to vector<2x128xf32>
    %36 = arith.addf %33, %35 : vector<2x128xf32>
    %c0_22 = arith.constant 0 : index
    %c0_23 = arith.constant 0 : index
    %37 = vector.load %arg10[%c0_22, %c0_23] : memref<2x128xf32, #tpu.memory_space<vmem>>, vector<2x128xf32>
    tpu.vector_store %arg10[%c0_22, %c0_23], %36 {strides = array<i32>} : memref<2x128xf32, #tpu.memory_space<vmem>>, vector<2x128xf32>,
    return
  }
  func.func @transform_0(%arg0: i32) -> (i32, i32) {
    %c0_i32 = arith.constant 0 : i32
    %c0_i32_0 = arith.constant 0 : i32
    return %c0_i32, %arg0 : i32, i32
  }
  func.func @transform_1(%arg0: i32) -> (i32, i32) {
    %c0_i32 = arith.constant 0 : i32
    %c0_i32_0 = arith.constant 0 : i32
    %c0_i32_1 = arith.constant 0 : i32
    return %c0_i32, %c0_i32_0 : i32, i32
  }
  func.func @transform_2(%arg0: i32) -> (i32, i32) {
    %c0_i32 = arith.constant 0 : i32
    %c0_i32_0 = arith.constant 0 : i32
    %c0_i32_1 = arith.constant 0 : i32
    return %c0_i32, %c0_i32_0 : i32, i32
  }
  func.func @transform_3(%arg0: i32) -> (i32, i32) {
    %c0_i32 = arith.constant 0 : i32
    %c0_i32_0 = arith.constant 0 : i32
    %c0_i32_1 = arith.constant 0 : i32
    return %c0_i32, %c0_i32_0 : i32, i32
  }
  func.func @transform_4(%arg0: i32) -> (i32, i32) {
    %c0_i32 = arith.constant 0 : i32
    %c0_i32_0 = arith.constant 0 : i32
    %c0_i32_1 = arith.constant 0 : i32
    return %c0_i32, %c0_i32_0 : i32, i32
  }
  func.func @transform_5(%arg0: i32) -> (i32, i32) {
    %c0_i32 = arith.constant 0 : i32
    %c0_i32_0 = arith.constant 0 : i32
    %c0_i32_1 = arith.constant 0 : i32
    return %c0_i32, %c0_i32_0 : i32, i32
  }
  func.func @transform_6(%arg0: i32) -> (i32, i32) {
    %c0_i32 = arith.constant 0 : i32
    %c0_i32_0 = arith.constant 0 : i32
    %c0_i32_1 = arith.constant 0 : i32
    return %c0_i32, %c0_i32_0 : i32, i32
  }
  func.func @transform_7(%arg0: i32) -> (i32, i32) {
    %c0_i32 = arith.constant 0 : i32
    %c0_i32_0 = arith.constant 0 : i32
    %c0_i32_1 = arith.constant 0 : i32
    return %c0_i32, %c0_i32_0 : i32, i32
  }
  func.func @transform_8(%arg0: i32) -> (i32, i32) {
    %c0_i32 = arith.constant 0 : i32
    %c0_i32_0 = arith.constant 0 : i32
    %c0_i32_1 = arith.constant 0 : i32
    return %c0_i32, %c0_i32_0 : i32, i32
  }
  func.func @transform_9(%arg0: i32) -> (i32, i32) {
    %c0_i32 = arith.constant 0 : i32
    %c0_i32_0 = arith.constant 0 : i32
    return %c0_i32, %arg0 : i32, i32
  }
}

</mosaic_0001>

<bundles_post_ra>
// kernel: tpu_custom_call.1
= control target key start
LH: loop header
LB: loop body
LE: loop exit
PB: predicated region body
PF: predicated region fallthrough
CT: control target
= control target key end

     0   :  { %v812_v2 = vmov 1   ;;  %v813_v7 = vmov 0   ;;  %s1022_s0 = inlined_call_operand.vmem [shape: f32[2,128], index: 0, kind: input, shape index: {}]   ;;  %s1023_s1 = inlined_call_operand.vmem [shape: f32[64,2], index: 1, kind: input, shape index: {}]   ;;  %s1024_s2 = inlined_call_operand.vmem [shape: f32[64,1], index: 2, kind: input, shape index: {}]   ;;  %s1025_s3 = inlined_call_operand.vmem [shape: f32[32,64], index: 3, kind: input, shape index: {}]   ;;  %s1026_s4 = inlined_call_operand.vmem [shape: f32[32,1], index: 4, kind: input, shape index: {}]   ;;  %s1027_s5 = inlined_call_operand.vmem [shape: f32[64,32], index: 5, kind: input, shape index: {}]   ;;  %s1028_s6 = inlined_call_operand.vmem [shape: f32[64,1], index: 6, kind: input, shape index: {}]   ;;  %s1029_s7 = inlined_call_operand.vmem [shape: f32[2,64], index: 7, kind: input, shape index: {}]   ;;  %s1030_s8 = inlined_call_operand.vmem [shape: f32[2,1], index: 8, kind: input, shape index: {}]   ;;  %s1031_s9 = inlined_call_operand.hbm [shape: f32[2,128], index: 9, kind: output, shape index: {}]  }
   0x1   :  { %v36_v0 = vld [vmem:[%s1023_s1 + $0x10] sm:$0xff]  ;;  %v34_v1 = vld [vmem:[%s1023_s1] sm:$0xff]  ;;  %780 = vset.pattern.permute.xlu0 %v812_v2  ;;  %778 = vset.pattern.permute.xlu1 %v812_v2  ;;  %v35_v4 = vld [vmem:[%s1023_s1 + $0x8] sm:$0xff] }
   0x2   :  { %103 = vperm.xlu0 %780, %v36_v0   ;;  %95 = vperm.xlu1 %778, %v34_v1   ;;  %v38_v3 = vld [vmem:[%s1023_s1 + $0x20] sm:$0xff]  ;;  %v40_v5 = vld [vmem:[%s1023_s1 + $0x30] sm:$0xff]  ;;  %v37_v6 = vld [vmem:[%s1023_s1 + $0x18] sm:$0xff] }
   0x6   :  { %111 = vperm.xlu0 %780, %v38_v3   ;;  %99 = vperm.xlu1 %778, %v35_v4  }
   0xa   :  { %119 = vperm.xlu0 %780, %v40_v5   ;;  %779 = vset.pattern.permute.xlu1 %v813_v7 }
   0xb   :  { %14 = vsyncpa [#allocation3], 0  ;;  %59 = vperm.xlu1 %779, %v37_v6   ;;  %v146_v8 = vld [vmem:[%s1024_s2] sm:$0xff]  ;;  %v147_v9 = vld [vmem:[%s1024_s2 + $0x8] sm:$0xff]  ;;  %vm238_vm0 = vcmask 523264   ;;  %v82_v34 = vlaneseq  ;;  %vm396_vm1 = vcmask 261120  }
   0xc   :  { %v39_v10 = vld [vmem:[%s1023_s1 + $0x28] sm:$0xff]  ;;  %v149_v11 = vld [vmem:[%s1024_s2 + $0x18] sm:$0xff]  ;;  %v214_v13 = vld [vmem:[%s1026_s4] sm:$0xff]  ;;  %vm815_vm2 = vmmov 0  }
   0xd   :  { %v151_v12 = vld [vmem:[%s1024_s2 + $0x28] sm:$0xff]  ;;  %v148_v14 = vld [vmem:[%s1024_s2 + $0x10] sm:$0xff]  ;;  %v348_v16 = vld [vmem:[%s1028_s6] sm:$0xff]  ;;  %v83_v37 = vshrl.u32 %v82_v34, 7 }
   0xe   :  { %785 = vset.pattern.permute.xlu0 %v813_v7  ;;  %v216_v15 = vld [vmem:[%s1026_s4 + $0x10] sm:$0xff]  ;;  %v41_v17 = vld [vmem:[%s1023_s1 + $0x38] sm:$0xff]  ;;  %v352_v19 = vld [vmem:[%s1028_s6 + $0x20] sm:$0xff] }
   0xf   :  { %44 = vperm.xlu0 %785, %v34_v1   ;;  %781 = vset.pattern.permute.xlu1 %v812_v2  ;;  %v350_v18 = vld [vmem:[%s1028_s6 + $0x10] sm:$0xff]  ;;  %v150_v20 = vld [vmem:[%s1024_s2 + $0x20] sm:$0xff]  ;;  %v153_v24 = vld [vmem:[%s1024_s2 + $0x38] sm:$0xff]  ;;  %v128_v40 = vsub.s32 1, %v83_v37  ;;  %v84_v41 = vsub.s32 0, %v83_v37 }
  0x10   :  { %107 = vperm.xlu1 %781, %v37_v6   ;;  %v354_v21 = vld [vmem:[%s1028_s6 + $0x30] sm:$0xff]  ;;  %v535_v23 = vld [vmem:[%s1030_s8] sm:$0x3]  ;;  %v215_v25 = vld [vmem:[%s1026_s4 + $0x8] sm:$0xff] }
  0x11   :  { %v152_v22 = vld [vmem:[%s1024_s2 + $0x30] sm:$0xff]  ;;  %v217_v26 = vld [vmem:[%s1026_s4 + $0x18] sm:$0xff]  ;;  %v210_v27 = vld [vmem:[%s1025_s3] sm:$0xff]  ;;  %s817_s4 = smov [#allocation2]  }
  0x12   :  { %691 = vmatprep.mubr.msk.f32.mxu0 %vm238_vm0, %v210_v27  ;;  %v349_v28 = vld [vmem:[%s1028_s6 + $0x8] sm:$0xff]  ;;  %v351_v29 = vld [vmem:[%s1028_s6 + $0x18] sm:$0xff]  ;;  %v33_v42 = vld [vmem:[%s1022_s0] sm:$0x3]  ;;  %s621_s21 = sshll.u32 %s817_s4, 4  ;;  %s622_s21 = int_to_ptr.vmem [resolvable:$true] %s621_s21 }
  0x13   :  { %49 = vperm.xlu0 %785, %v35_v4   ;;  %v353_v30 = vld [vmem:[%s1028_s6 + $0x28] sm:$0xff]  ;;  %v355_v31 = vld [vmem:[%s1028_s6 + $0x38] sm:$0xff]  ;;  %v129_v45 = vrot.slane %v33_v42, %v128_v40  ;;  %v85_v46 = vrot.slane %v33_v42, %v84_v41  ;;  %s788_s22 = scalar_lea.vmem %s622_s21, 32  ;;  %p793_p1 = scmp.lt.s32.totalorder %s622_s21, %s622_s21 }
  0x14   :  { %782 = vset.pattern.permute.xlu1 %v813_v7  ;;  %p789_p0 = scmp.ne.s32.totalorder %s622_s21, %s788_s22  ;;  %p794_p2 = scmp.lt.s32.totalorder %s788_s22, %s788_s22 }
  0x15   :  { %156 = vperm.xlu1 %782, %v146_v8  }
  0x16   :  { %p795_p3 = por %p794_p2, %p793_p1 }
  0x17   :  { %54 = vperm.xlu0 %785, %v36_v0  }
  0x18   :  { %p796_p4 = pnand %p795_p3, %p789_p0 }
  0x19   :  { %64 = vperm.xlu1 %782, %v38_v3  }
  0x1b   :  { %161 = vperm.xlu0 %785, %v147_v9  }
  0x1d   :  { %69 = vperm.xlu1 %782, %v39_v10  }
  0x1f   :  { %171 = vperm.xlu0 %785, %v149_v11  }
  0x21   :  { %783 = vset.pattern.permute.xlu1 %v812_v2 }
  0x22   :  { %115 = vperm.xlu1 %783, %v39_v10  }
  0x23   :  { %181 = vperm.xlu0 %785, %v151_v12  }
  0x26   :  { %784 = vset.pattern.permute.xlu1 %v813_v7 }
  0x27   :  { %220 = vperm.xlu0 %785, %v214_v13   ;;  %166 = vperm.xlu1 %784, %v148_v14  }
  0x2b   :  { %230 = vperm.xlu0 %785, %v216_v15   ;;  %74 = vperm.xlu1 %784, %v40_v5  }
  0x2f   :  { %358 = vperm.xlu0 %785, %v348_v16   ;;  %79 = vperm.xlu1 %784, %v41_v17  }
  0x33   :  { %368 = vperm.xlu0 %785, %v350_v18   ;;  %786 = vset.pattern.permute.xlu1 %v812_v2 }
  0x34   :  { %123 = vperm.xlu1 %786, %v41_v17  }
  0x37   :  { %378 = vperm.xlu0 %785, %v352_v19  }
  0x38   :  { %787 = vset.pattern.permute.xlu1 %v813_v7 }
  0x39   :  { %176 = vperm.xlu1 %787, %v150_v20  }
  0x3b   :  { %388 = vperm.xlu0 %785, %v354_v21  }
  0x3d   :  { %186 = vperm.xlu1 %787, %v152_v22  }
  0x3f   :  { %538 = vperm.xlu0 %785, %v535_v23  }
  0x41   :  { %191 = vperm.xlu1 %787, %v153_v24  }
  0x45   :  { %225 = vperm.xlu1 %787, %v215_v25  }
  0x49   :  { %235 = vperm.xlu1 %787, %v217_v26  }
  0x4d   :  { %363 = vperm.xlu1 %787, %v349_v28  }
  0x51   :  { %373 = vperm.xlu1 %787, %v351_v29  }
  0x55   :  { %383 = vperm.xlu1 %787, %v353_v30  }
  0x59   :  { %393 = vperm.xlu1 %787, %v355_v31  }
  0x81   :  { %v96_v32 = vpop.permute.xlu1 %95  ;;  %v104_v33 = vpop.permute.xlu0 %103 }
  0x82   :  { %v130_v50 = vmul.f32 %v129_v45, %v96_v32  ;;  %v132_v1 = vmul.f32 %v129_v45, %v104_v33 }
  0x85   :  { %v100_v35 = vpop.permute.xlu1 %99  ;;  %v112_v36 = vpop.permute.xlu0 %111 }
  0x86   :  { %v131_v53 = vmul.f32 %v129_v45, %v100_v35  ;;  %v134_v18 = vmul.f32 %v129_v45, %v112_v36 }
  0x89   :  { %v120_v38 = vpop.permute.xlu0 %119 }
  0x8a   :  { %v60_v39 = vpop.permute.xlu1 %59  ;;  %v136_v28 = vmul.f32 %v129_v45, %v120_v38  ;;  %v211_v38 = vld [vmem:[%s1025_s3 + $0x8] sm:$0xff] }
  0x8b   :  { %v89_v2 = vmul.f32 %v85_v46, %v60_v39 }
  0x8e   :  { %v45_v43 = vpop.permute.xlu0 %44 }
  0x8f   :  { %v108_v44 = vpop.permute.xlu1 %107  ;;  %v86_v48 = vmul.f32 %v85_v46, %v45_v43 }
  0x90   :  { %v133_v63 = vmul.f32 %v129_v45, %v108_v44  ;;  %v212_v44 = vld [vmem:[%s1025_s3 + $0x10] sm:$0xff] }
  0x91   :  { %v138_v54 = vadd.f32 %v130_v50, %v86_v48 }
  0x92   :  { %v50_v47 = vpop.permute.xlu0 %49  ;;  %v141_v6 = vadd.f32 %v133_v63, %v89_v2  ;;  %v342_v2 = vld [vmem:[%s1027_s5 + $0x10] sm:$0xff] }
  0x93   :  { %v87_v51 = vmul.f32 %v85_v46, %v50_v47 }
  0x94   :  { %v157_v49 = vpop.permute.xlu1 %156 }
  0x95   :  { %v194_v56 = vadd.f32 %v157_v49, %v138_v54  ;;  %v139_v57 = vadd.f32 %v131_v53, %v87_v51 }
  0x96   :  { %v55_v52 = vpop.permute.xlu0 %54 }
  0x97   :  { %v202_v61 = vmax.f32 %v194_v56, 0.0  ;;  %v88_v3 = vmul.f32 %v85_v46, %v55_v52 }
  0x98   :  { %v65_v55 = vpop.permute.xlu1 %64 }
  0x99   :  { %v140_v8 = vadd.f32 %v132_v1, %v88_v3  ;;  %v90_v19 = vmul.f32 %v85_v46, %v65_v55  ;;  %v341_v1 = vld [vmem:[%s1027_s5 + $0x8] sm:$0xff]  ;;  %v343_v3 = vld [vmem:[%s1027_s5 + $0x18] sm:$0xff] }
  0x9a   :  { %v162_v58 = vpop.permute.xlu0 %161 }
  0x9b   :  { %v195_v59 = vadd.f32 %v162_v58, %v139_v57  ;;  %v142_v24 = vadd.f32 %v134_v18, %v90_v19 }
  0x9c   :  { %v70_v60 = vpop.permute.xlu1 %69 }
  0x9d   :  { %v203_v62 = vmax.f32 %v195_v59, 0.0  ;;  %v91_v17 = vmul.f32 %v85_v46, %v70_v60 }
  0x9e   :  { %v172_v5 = vpop.permute.xlu0 %171 }
  0x9f   :  { %v736_v0 = vpack.c.bf16 %v203_v62, %v202_v61  ;;  %v197_v7 = vadd.f32 %v172_v5, %v141_v6  ;;  %v345_v5 = vld [vmem:[%s1027_s5 + $0x28] sm:$0xff]  ;;  %v346_v6 = vld [vmem:[%s1027_s5 + $0x30] sm:$0xff] }
  0xa1   :  { %v116_v4 = vpop.permute.xlu1 %115  ;;  %737 = vmatprep.subr.bf16.mxu0 %v736_v0  ;;  %v205_v11 = vmax.f32 %v197_v7, 0.0  ;;  %v347_v7 = vld [vmem:[%s1027_s5 + $0x38] sm:$0xff] }
  0xa2   :  { %739 = vmatpush3.bf16.msra.mxu0 %v736_v0  ;;  %v135_v16 = vmul.f32 %v129_v45, %v116_v4  ;;  %v182_v22 = vpop.permute.xlu0 %181  ;;  %v344_v4 = vld [vmem:[%s1027_s5 + $0x20] sm:$0xff] }
  0xa4   :  { %v143_v20 = vadd.f32 %v135_v16, %v91_v17 }
  0xa6   :  { %v167_v9 = vpop.permute.xlu1 %166  ;;  %v199_v23 = vadd.f32 %v182_v22, %v143_v20  ;;  %v221_v48 = vpop.permute.xlu0 %220 }
  0xa7   :  { %v196_v10 = vadd.f32 %v167_v9, %v140_v8  ;;  %v814_v8 = vmov 0.0|0.0   ;;  %v816_v9 = vmov 0.0  }
  0xa8   :  { %v207_v29 = vmax.f32 %v199_v23, 0.0 }
  0xa9   :  { %v204_v12 = vmax.f32 %v196_v10, 0.0 }
  0xaa   :  { %v75_v13 = vpop.permute.xlu1 %74  ;;  %v231_v57 = vpop.permute.xlu0 %230 }
  0xab   :  { %v740_v14 = vpack.c.bf16 %v205_v11, %v204_v12  ;;  %v92_v26 = vmul.f32 %v85_v46, %v75_v13 }
  0xad   :  { %741 = vmatprep.subr.bf16.mxu0 %v740_v14  ;;  %v144_v35 = vadd.f32 %v136_v28, %v92_v26 }
  0xae   :  { %v80_v15 = vpop.permute.xlu1 %79  ;;  %743 = vmatpush3.bf16.msra.mxu0 %v740_v14  ;;  %v359_v11 = vpop.permute.xlu0 %358 }
  0xaf   :  { %v93_v33 = vmul.f32 %v85_v46, %v80_v15  ;;  %v340_v46 = vld [vmem:[%s1027_s5] sm:$0xff] }
  0xb0   :  { %705 = vmatprep.mubr.msk.f32.mxu1 %vm396_vm1, %v340_v46  ;;  %v534_v46 = vld [vmem:[%s1029_s7] sm:$0x3] }
  0xb2   :  { %v369_v14 = vpop.permute.xlu0 %368 }
  0xb3   :  { %v124_v21 = vpop.permute.xlu1 %123 }
  0xb4   :  { %v137_v30 = vmul.f32 %v129_v45, %v124_v21  ;;  %v213_v45 = vld [vmem:[%s1025_s3 + $0x18] sm:$0xff] }
  0xb6   :  { %v145_v36 = vadd.f32 %v137_v30, %v93_v33  ;;  %v379_v26 = vpop.permute.xlu0 %378 }
  0xb8   :  { %v177_v25 = vpop.permute.xlu1 %176 }
  0xb9   :  { %v198_v27 = vadd.f32 %v177_v25, %v142_v24 }
  0xbb   :  { %v206_v31 = vmax.f32 %v198_v27, 0.0 }
  0xbc   :  { %v187_v32 = vpop.permute.xlu1 %186 }
  0xbd   :  { %v744_v34 = vpack.c.bf16 %v207_v29, %v206_v31  ;;  %v200_v37 = vadd.f32 %v187_v32, %v144_v35 }
  0xbf   :  { %745 = vmatprep.subr.bf16.mxu0 %v744_v34  ;;  %v208_v41 = vmax.f32 %v200_v37, 0.0 }
  0xc0   :  { %v192_v39 = vpop.permute.xlu1 %191  ;;  %747 = vmatpush3.bf16.msra.mxu0 %v744_v34 }
  0xc1   :  { %v201_v40 = vadd.f32 %v192_v39, %v145_v36  ;;  %v389_v39 = vpop.permute.xlu0 %388 }
  0xc3   :  { %v209_v42 = vmax.f32 %v201_v40, 0.0 }
  0xc4   :  { %v226_v47 = vpop.permute.xlu1 %225 }
  0xc5   :  { %v748_v43 = vpack.c.bf16 %v209_v42, %v208_v41 }
  0xc7   :  { %749 = vmatprep.subr.bf16.mxu0 %v748_v43 }
  0xc8   :  { %751 = vmatpush3.bf16.msra.mxu0 %v748_v43  ;;  %v236_v54 = vpop.permute.xlu1 %235 }
  0xcb   :  { %692 = vmatmul.mubr.msk.f32.vlgmr.msra.gmra.mrb[0].mxu0 %vm238_vm0, %v211_v38 }
  0xcc   :  { %694 = vmatprep.mubr.msk.f32.mxu0 %vm238_vm0, %v212_v44  ;;  %v364_v10 = vpop.permute.xlu1 %363 }
  0xcf   :  { %695 = vmatmul.mubr.msk.f32.gmra.mrb[2].mxu0 %vm238_vm0, %v213_v45 }
  0xd0   :  { %v374_v12 = vpop.permute.xlu1 %373 }
  0xd4   :  { %v384_v23 = vpop.permute.xlu1 %383 }
  0xd8   :  { %v394_v35 = vpop.permute.xlu1 %393 }
 0x19e   :  { %v693_v49 = vpop.f32.mrb[0].mxu0 }
 0x19f   :  { %v323_v50 = vadd.f32 %v693_v49, %v226_v47  ;;  %v317_v51 = vpop.f32.mrb[1].mxu0  ;;  %v539_v47 = vpop.permute.xlu0 %538 }
 0x1a0   :  { %v318_v52 = vadd.f32 %v317_v51, %v221_v48 }
 0x1a1   :  { %v337_v53 = vmax.f32 %v323_v50, 0.0 }
 0x1a2   :  { %v336_v55 = vmax.f32 %v318_v52, 0.0  ;;  %v696_v56 = vpop.f32.mrb[2].mxu0 }
 0x1a3   :  { %v333_v58 = vadd.f32 %v696_v56, %v236_v54  ;;  %v327_v59 = vpop.f32.mrb[3].mxu0 }
 0x1a4   :  { %v328_v60 = vadd.f32 %v327_v59, %v231_v57  ;;  %v752_v61 = vpack.c.bf16 %v337_v53, %v336_v55 }
 0x1a5   :  { %v339_v62 = vmax.f32 %v333_v58, 0.0 }
 0x1a6   :  { %v338_v63 = vmax.f32 %v328_v60, 0.0  ;;  %753 = vmatprep.subr.bf16.mxu1 %v752_v61 }
 0x1a7   :  { %755 = vmatpush3.bf16.msra.mxu1 %v752_v61 }
 0x1a8   :  { %v756_v0 = vpack.c.bf16 %v339_v62, %v338_v63 }
 0x1aa   :  { %757 = vmatprep.subr.bf16.mxu1 %v756_v0 }
 0x1ab   :  { %759 = vmatpush3.bf16.msra.mxu1 %v756_v0 }
 0x1ac   :  { %760 = vmatprep.subr.bf16.mxu1 %v814_v8 }
 0x1ae   :  { %706 = vmatmul.mubr.msk.f32.vlgmr.msra.gmra.mrb[0].mxu1 %vm396_vm1, %v341_v1 }
 0x1af   :  { %708 = vmatprep.mubr.msk.f32.mxu1 %vm396_vm1, %v342_v2 }
 0x1b2   :  { %709 = vmatmul.mubr.msk.f32.gmra.mrb[2].mxu1 %vm396_vm1, %v343_v3 }
 0x1b3   :  { %711 = vmatprep.mubr.msk.f32.mxu1 %vm396_vm1, %v344_v4 }
 0x1b6   :  { %712 = vmatmul.mubr.msk.f32.gmra.mrb[4].mxu1 %vm396_vm1, %v345_v5 }
 0x1b7   :  { %714 = vmatprep.mubr.msk.f32.mxu1 %vm396_vm1, %v346_v6 }
 0x1ba   :  { %715 = vmatmul.mubr.msk.f32.gmra.mrb[6].mxu1 %vm396_vm1, %v347_v7 }
 0x1bb   :  { %733 = vmatprep.mubr.msk.f32.mxu1 %vm815_vm2, %v816_v9 }
 0x281   :  { %v707_v13 = vpop.f32.mrb[0].mxu1 }
 0x282   :  { %v493_v15 = vadd.f32 %v707_v13, %v364_v10  ;;  %v487_v16 = vpop.f32.mrb[1].mxu1 }
 0x283   :  { %v488_v17 = vadd.f32 %v487_v16, %v359_v11 }
 0x284   :  { %v527_v18 = vmax.f32 %v493_v15, 0.0 }
 0x285   :  { %v526_v19 = vmax.f32 %v488_v17, 0.0  ;;  %v710_v20 = vpop.f32.mrb[2].mxu1 }
 0x286   :  { %v503_v21 = vadd.f32 %v710_v20, %v374_v12  ;;  %v497_v22 = vpop.f32.mrb[3].mxu1 }
 0x287   :  { %v761_v24 = vpack.c.bf16 %v527_v18, %v526_v19  ;;  %v498_v25 = vadd.f32 %v497_v22, %v369_v14 }
 0x288   :  { %v529_v27 = vmax.f32 %v503_v21, 0.0 }
 0x289   :  { %v528_v28 = vmax.f32 %v498_v25, 0.0  ;;  %v713_v29 = vpop.f32.mrb[4].mxu1  ;;  %762 = vmatpush3.bf16.msra.mxu1 %v761_v24 }
 0x28a   :  { %v513_v30 = vadd.f32 %v713_v29, %v384_v23  ;;  %v507_v31 = vpop.f32.mrb[5].mxu1  ;;  %763 = vmatprep.subr.bf16.mxu1 %v814_v8 }
 0x28b   :  { %v764_v32 = vpack.c.bf16 %v529_v27, %v528_v28  ;;  %v508_v33 = vadd.f32 %v507_v31, %v379_v26 }
 0x28c   :  { %v531_v34 = vmax.f32 %v513_v30, 0.0 }
 0x28d   :  { %v530_v37 = vmax.f32 %v508_v33, 0.0  ;;  %v716_v36 = vpop.f32.mrb[6].mxu1  ;;  %765 = vmatpush3.bf16.msra.mxu1 %v764_v32 }
 0x28e   :  { %v523_v40 = vadd.f32 %v716_v36, %v394_v35  ;;  %v517_v41 = vpop.f32.mrb[7].mxu1  ;;  %766 = vmatprep.subr.bf16.mxu1 %v814_v8 }
 0x28f   :  { %v767_v42 = vpack.c.bf16 %v531_v34, %v530_v37  ;;  %v518_v43 = vadd.f32 %v517_v41, %v389_v39 }
 0x290   :  { %v533_v38 = vmax.f32 %v523_v40, 0.0 }
 0x291   :  { %v532_v44 = vmax.f32 %v518_v43, 0.0  ;;  %768 = vmatpush3.bf16.msra.mxu1 %v767_v42 }
 0x292   :  { %769 = vmatprep.subr.bf16.mxu1 %v814_v8 }
 0x293   :  { %v770_v45 = vpack.c.bf16 %v533_v38, %v532_v44 }
 0x295   :  { %771 = vmatpush3.bf16.msra.mxu1 %v770_v45 }
 0x298   :  { %734 = vmatmul.mubr.msk.f32.vlgmr.msra.gmra.mrb[8].mxu1 %vm238_vm0, %v534_v46 }
 0x36b   :  { %v610_v48 = vpop.f32.mrb[8].mxu1 }
 0x36c   :  { %v611_v49 = vadd.f32 %v610_v48, %v539_v47  ;;  %v735_v50 = vpop.f32.mrb[9].mxu1 }
 0x36e   :  { %614 = vst [vmem:[#allocation2] sm:$0x3] %v611_v49 }
 0x36f   :  { %799 = shalt.err (!%p796_p4)
}
 0x370   :  { %s800_s7 = scalar_lea.hbm %s1031_s9, 32 }
 0x371   :  { %p801_p5 = scmp.ne.s32.totalorder %s1031_s9, %s800_s7  ;;  %p804_p6 = scmp.lt.u32.totalorder %s800_s7, %s1031_s9 }
 0x373   :  { %p806_p7 = pnand %p804_p6, %p801_p5 }
 0x375   :  { %809 = shalt.err (!%p806_p7)
}
 0x376   :  { %624 = dma.vmem_to_hbm [thread:$0]  %s622_s21, 32, %s1031_s9, [#allocation3]  }
 0x377   :  { %810 = dma.done.wait [#allocation3], 32  }
 0x378   :  { %811 = vsyncadd [#allocation3], 4294967264 }
 0x379   :  { %628 = vsyncpa [#allocation3], 1 }

</bundles_post_ra>
